<compile_context>
chip_gen: v7x
topology: tpu7x:2x2x1
jax: 0.10.0
libtpu: 0.0.40
codegen_flags: <defaults>
</compile_context>

<pallas_src>
import functools

import jax
import jax.numpy as jnp
from jax.experimental import pallas as pl
from jax.experimental.pallas import tpu as pltpu


def _round_up(a, b):
    return (a + b - 1) // b * b


def _choose_tm(L, cin_g, cout_g, itemsize=4,
               vmem_budget_bytes=8 * 1024 * 1024, max_tm=2048):
    """Lane-tile size: multiple of 128, double-buffered blocks fit the budget."""
    per_lane_bytes = 2 * (cin_g + cout_g) * itemsize      # 2 = double buffering
    cap = (vmem_budget_bytes // per_lane_bytes) // 128 * 128
    tm = max(128, min(max_tm, cap))
    return min(tm, _round_up(L, 128))


def _gpconv_kernel(x_ref, w_ref, o_ref, *, use_vpu):
    # x_ref: (Cin_g, tm), w_ref: (Cout_g, Cin_g), o_ref: (Cout_g, tm)
    x = x_ref[...]
    w = w_ref[...]
    if use_vpu:
        # Tiny contraction dim: outer-product accumulation on the VPU.
        # acc[co, m] = sum_ci w[co, ci] * x[ci, m]
        cin_g = x_ref.shape[0]
        acc = w[:, 0:1] * x[0:1, :]
        for ci in range(1, cin_g):
            acc = acc + w[:, ci:ci + 1] * x[ci:ci + 1, :]
    else:
        # Large contraction dim: use the MXU.
        acc = jnp.dot(w, x, preferred_element_type=jnp.float32)
    o_ref[...] = acc.astype(o_ref.dtype)


def gpconv_pallas(x_g, w_g, *, tm):
    """x_g: (N, G, Cin_g, L_pad), w_g: (G, Cout_g, Cin_g) -> (N, G, Cout_g, L_pad)."""
    N, G, Cin_g, L_pad = x_g.shape
    Cout_g = w_g.shape[1]
    assert L_pad % tm == 0 and tm % 128 == 0

    kernel = functools.partial(_gpconv_kernel, use_vpu=(Cin_g <= 16))

    return pl.pallas_call(
        kernel,
        out_shape=jax.ShapeDtypeStruct((N, G, Cout_g, L_pad), x_g.dtype),
        grid_spec=pltpu.PrefetchScalarGridSpec(
            num_scalar_prefetch=0,
            grid=(N, G, L_pad // tm),
            in_specs=[
                # activations: lane-dense (Cin_g, tm) tiles, tiled over spatial
                pl.BlockSpec((None, None, Cin_g, tm),
                             lambda n, g, m: (n, g, 0, m)),
                # tiny per-group weight; index_map independent of the M axis so it
                # stays resident across all m steps of a group.
                pl.BlockSpec((None, Cout_g, Cin_g),
                             lambda n, g, m: (g, 0, 0)),
            ],
            out_specs=pl.BlockSpec((None, None, Cout_g, tm),
                                   lambda n, g, m: (n, g, 0, m)),
        ),
        compiler_params=pltpu.CompilerParams(
            dimension_semantics=("parallel", "parallel", "parallel"),
        ),
    )(x_g, w_g)


def gpconv_forward(x_nchw, weights):
    """Full GPConv forward.

    x_nchw  : (N, Cin, H, W) float32
    weights : list of G arrays, each (Cout_g, Cin_g, 1, 1) (torch Conv2d layout)
    returns : (N, Cout, H, W)
    """
    G = len(weights)
    N, Cin, H, W = x_nchw.shape
    assert Cin % G == 0
    Cin_g = Cin // G
    # all groups must share the same channel split (true for MixNet's GPConv)
    assert all(w.shape == weights[0].shape for w in weights)
    Cout_g = weights[0].shape[0]
    L = H * W

    # --- zero-copy glue: pure reshapes, no NCHW<->NHWC transposes ---
    x_g = x_nchw.reshape(N, G, Cin_g, L)                    # free reshape
    w_g = jnp.stack([w[:, :, 0, 0] for w in weights], 0)    # (G, Cout_g, Cin_g)

    tm = _choose_tm(L, Cin_g, Cout_g, itemsize=x_nchw.dtype.itemsize)
    L_pad = _round_up(L, tm)
    if L_pad != L:
        x_g = jnp.pad(x_g, ((0, 0), (0, 0), (0, 0), (0, L_pad - L)))

    out_g = gpconv_pallas(x_g, w_g, tm=tm)                  # (N, G, Cout_g, L_pad)

    out = out_g[..., :L].reshape(N, G * Cout_g, H, W)       # free reshape
    return out


def gpconv_reference(x_nchw, weights):
    """Pure-JAX reference (same math as torch: chunk -> 1x1 conv -> cat)."""
    G = len(weights)
    N, Cin, H, W = x_nchw.shape
    Cin_g = Cin // G
    outs = []
    for g in range(G):
        xg = x_nchw[:, g * Cin_g:(g + 1) * Cin_g]            # (N, Cin_g, H, W)
        w = weights[g][:, :, 0, 0]                           # (Cout_g, Cin_g)
        outs.append(jnp.einsum("ncHW,oc->noHW", xg, w))
    return jnp.concatenate(outs, axis=1)


if __name__ == "__main__":
    # Module config: in_planes=4, out_planes=8, kernel_sizes=[3, 5] -> 2 groups,
    # each group is a 1x1 conv mapping 2 -> 4 channels.
    # TODO(synk): rest of MixNet (depthwise MDConv, BN, SE, classifier) is outside
    # the scope of this GPConv kernel.
    in_planes, out_planes = 4, 8
    kernel_sizes = [3, 5]
    G = len(kernel_sizes)
    Cin_g, Cout_g = in_planes // G, out_planes // G

    N, H, W = 2, 16, 16

    key = jax.random.PRNGKey(0)
    kx, *kw = jax.random.split(key, 1 + G)
    x = jax.random.normal(kx, (N, in_planes, H, W), dtype=jnp.float32)
    # deterministic synthetic weights in torch Conv2d layout (Cout_g, Cin_g, 1, 1)
    weights = [
        0.1 * jax.random.normal(kw[g], (Cout_g, Cin_g, 1, 1), dtype=jnp.float32)
        for g in range(G)
    ]

    out = gpconv_forward(x, weights)
    out = jax.block_until_ready(out)

    ref = gpconv_reference(x, weights)
    assert out.shape == (N, out_planes, H, W), out.shape
    assert jnp.allclose(out, ref, atol=1e-5, rtol=1e-5), "mismatch vs reference"

    print("KERNEL_OK")
</pallas_src>

<mosaic_0001>
module attributes {stable_mosaic.version = 11 : i64} {
  func.func @_gpconv_kernel(%arg0: i32, %arg1: i32, %arg2: i32, %arg3: memref<1x1x2x256xf32, #tpu.memory_space<vmem>>, %arg4: memref<1x4x2xf32, #tpu.memory_space<vmem>>, %arg5: memref<1x1x4x256xf32, #tpu.memory_space<vmem>>) attributes {dimension_semantics = [#tpu.dimension_semantics<parallel>, #tpu.dimension_semantics<parallel>, #tpu.dimension_semantics<parallel>], iteration_bounds = array<i64: 2, 2, 1>, scalar_prefetch = 0 : i64, scratch_operands = 0 : i64, tpu.core_type = #tpu.core_type<tc>, window_params = [{transform_indices = @transform_0, window_bounds = array<i64: 1, 1, 2, 256>}, {transform_indices = @transform_1, window_bounds = array<i64: 1, 4, 2>}, {transform_indices = @transform_2, window_bounds = array<i64: 1, 1, 4, 256>}]} {
    %c0 = arith.constant 0 : index
    %c0_0 = arith.constant 0 : index
    %c0_1 = arith.constant 0 : index
    %c0_2 = arith.constant 0 : index
    %0 = vector.load %arg3[%c0, %c0_0, %c0_1, %c0_2] : memref<1x1x2x256xf32, #tpu.memory_space<vmem>>, vector<1x1x2x256xf32>
    %1 = vector.shape_cast %0 : vector<1x1x2x256xf32> to vector<2x256xf32>
    %c0_3 = arith.constant 0 : index
    %c0_4 = arith.constant 0 : index
    %c0_5 = arith.constant 0 : index
    %2 = vector.load %arg4[%c0_3, %c0_4, %c0_5] : memref<1x4x2xf32, #tpu.memory_space<vmem>>, vector<1x4x2xf32>
    %3 = vector.shape_cast %2 : vector<1x4x2xf32> to vector<4x2xf32>
    %4 = vector.extract_strided_slice %3 {offsets = [0, 0], sizes = [4, 1], strides = [1, 1]} : vector<4x2xf32> to vector<4x1xf32>
    %5 = vector.extract_strided_slice %1 {offsets = [0, 0], sizes = [1, 256], strides = [1, 1]} : vector<2x256xf32> to vector<1x256xf32>
    %6 = vector.broadcast %4 : vector<4x1xf32> to vector<4x256xf32>
    %7 = vector.broadcast %5 : vector<1x256xf32> to vector<4x256xf32>
    %8 = arith.mulf %6, %7 : vector<4x256xf32>
    %9 = vector.extract_strided_slice %3 {offsets = [0, 1], sizes = [4, 1], strides = [1, 1]} : vector<4x2xf32> to vector<4x1xf32>
    %10 = vector.extract_strided_slice %1 {offsets = [1, 0], sizes = [1, 256], strides = [1, 1]} : vector<2x256xf32> to vector<1x256xf32>
    %11 = vector.broadcast %9 : vector<4x1xf32> to vector<4x256xf32>
    %12 = vector.broadcast %10 : vector<1x256xf32> to vector<4x256xf32>
    %13 = arith.mulf %11, %12 : vector<4x256xf32>
    %14 = arith.addf %8, %13 : vector<4x256xf32>
    %c0_6 = arith.constant 0 : index
    %c0_7 = arith.constant 0 : index
    %c0_8 = arith.constant 0 : index
    %c0_9 = arith.constant 0 : index
    %15 = vector.load %arg5[%c0_6, %c0_7, %c0_8, %c0_9] : memref<1x1x4x256xf32, #tpu.memory_space<vmem>>, vector<1x1x4x256xf32>
    %16 = vector.shape_cast %15 : vector<1x1x4x256xf32> to vector<4x256xf32>
    %17 = vector.shape_cast %14 : vector<4x256xf32> to vector<1x1x4x256xf32>
    tpu.vector_store %arg5[%c0_6, %c0_7, %c0_8, %c0_9], %17 {strides = array<i32>} : memref<1x1x4x256xf32, #tpu.memory_space<vmem>>, vector<1x1x4x256xf32>,
    return
  }
  func.func @transform_0(%arg0: i32, %arg1: i32, %arg2: i32) -> (i32, i32, i32, i32) {
    %c0_i32 = arith.constant 0 : i32
    %c0_i32_0 = arith.constant 0 : i32
    return %arg0, %arg1, %c0_i32, %arg2 : i32, i32, i32, i32
  }
  func.func @transform_1(%arg0: i32, %arg1: i32, %arg2: i32) -> (i32, i32, i32) {
    %c0_i32 = arith.constant 0 : i32
    %c0_i32_0 = arith.constant 0 : i32
    %c0_i32_1 = arith.constant 0 : i32
    return %arg1, %c0_i32, %c0_i32_0 : i32, i32, i32
  }
  func.func @transform_2(%arg0: i32, %arg1: i32, %arg2: i32) -> (i32, i32, i32, i32) {
    %c0_i32 = arith.constant 0 : i32
    %c0_i32_0 = arith.constant 0 : i32
    return %arg0, %arg1, %c0_i32, %arg2 : i32, i32, i32, i32
  }
}

</mosaic_0001>

<bundles_post_ra>
// kernel: tpu_custom_call.1
= control target key start
LH: loop header
LB: loop body
LE: loop exit
PB: predicated region body
PF: predicated region fallthrough
CT: control target
= control target key end

     0   :  { %7 = vsyncpa [#allocation3], 0  ;;  %s843_s0 = inlined_call_operand.hbm [shape: f32[2,2,2,256], index: 0, kind: input, shape index: {}]   ;;  %s844_s1 = inlined_call_operand.vmem [shape: f32[2,4,2], index: 1, kind: input, shape index: {}]   ;;  %s845_s2 = inlined_call_operand.hbm [shape: f32[2,2,4,256], index: 2, kind: output, shape index: {}]  }
   0x1   :  { %9 = vsyncpa [#allocation3 + $0x1], 0 }
   0x2   :  { %10 = vsyncpa [#allocation4], 0 }
   0x3   :  { %12 = vsyncpa [#allocation4 + $0x1], 0  ;;  %s643_s9 = smov 0   ;;  %s645_s10 = smov 0  }
   0x4   :  { %s647_s11 = smov 0   ;;  %s649_s12 = smov 0  }
   0x5   :  { %s651_s13 = smov 0   ;;  %s653_s14 = smov 0  }
   0x6   :  { %s655_s15 = smov 0   ;;  %s657_s16 = smov 0  }
   0x7 LB: > { %s394_s17 = sadd.s32 4294967295, %s622_s16   ;;  %s395_s18 = sadd.s32 4294967294, %s622_s16   ;;  %s622_s16 = sphi %s657_s16, %s18_s16   ;;  %s618_s15 = sphi %s655_s15, %s862_s15   ;;  %s614_s14 = sphi %s653_s14, %s861_s14   ;;  %s610_s13 = sphi %s651_s13, %s860_s13   ;;  %s606_s12 = sphi %s649_s12, %s859_s12   ;;  %s602_s11 = sphi %s647_s11, %s858_s11   ;;  %s598_s10 = sphi %s645_s10, %s857_s10   ;;  %s594_s9 = sphi %s643_s9, %s856_s9  }
   0x8   : > { %s33_s19 = sadd.s32 1, %s614_s14  ;;  %s37_s20 = sadd.s32 1, %s618_s15 }
   0x9   : > { %p35_p0 = scmp.ge.s32.totalorder %s33_s19, 2  ;;  %s48_s21 = sadd.s32 1, %s602_s11 }
   0xa   : > { %p55_p1 = scmp.ne.s32.totalorder %s602_s11, %s598_s10  ;;  %p56_p2 = scmp.eq.s32.totalorder %s622_s16, 0 }
   0xb   : > { %s864_s19 = smov (%p35_p0, %s33_s19), 0  ;;  %s866_s20 = smov (!%p35_p0, %s37_s20), %s618_s15 }
   0xc   : > { %s42_s22 = ssub.s32 %s614_s14, %s864_s19  ;;  %p696_p3 = por %p56_p2, %p55_p1 }
   0xd   : > { %p39_p4 = scmp.ge.s32.totalorder %s866_s20, 2  ;;  %p61_p5 = scmp.ne.s32.totalorder %s598_s10, %s594_s9 }
   0xe   : > { %p62_p6 = scmp.eq.s32.totalorder %s394_s17, 0  ;;  %p115_p7 = scmp.eq.s32.totalorder %s394_s17, 3 }
   0xf   : > { %s868_s20 = smov (%p39_p4, %s866_s20), 0  ;;  %p121_p10 = scmp.eq.s32.totalorder %s395_s18, 3 }
  0x10   : > { %p704_p8 = por %p62_p6, %p61_p5  ;;  %p708_p9 = por %p115_p7, %p55_p1 }
  0x11   : > { %s41_s26 = ssub.s32 %s618_s15, %s868_s20  ;;  %p714_p12 = por %p121_p10, %p61_p5 }
  0x12   : > { %s849_s25 = scalar_select %p708_p9, 1, 0 }
  0x13   : > { %s43_s27 = sor.u32 %s42_s22, %s41_s26  ;;  %p424_p13 = scmp.lt.s32.totalorder %s622_s16, 4 }
  0x14   : > { %p46_p11 = scmp.eq.s32.totalorder %s43_s27, 0  ;;  %s141_s29 = sand.u32 1, %s602_s11  }
  0x15   : > { %s850_s28 = scalar_select %p714_p12, 1, 0 }
  0x16   : > { %s721_s30 = scalar_select %p46_p11, %s602_s11, %s48_s21  }
  0x17   : > { %s398_s3 = sshll.u32 %s141_s29, 2  ;;  %s399_s4 = sshll.u32 %s614_s14, 1 }
  0x18   : > { %s400_s5 = sshll.u32 %s618_s15, 2  ;;  %s145_s6 = scalar_lea.vmem [#allocation2], %s398_s3 }
  0x19   : > { %s157_s7 = sshll.u32 %s145_s6, 4  ;;  %s153_s8 = sadd.s32 %s400_s5, %s399_s4  ;;  %s725_s7 = int_to_ptr.vmem [resolvable:$true] %s157_s7 }
  0x1a   : > { %s401_s17 = sshll.u32 %s153_s8, 5  ;;  %p729_p0 = pnand %p424_p13, %p696_p3 }
  0x1b   : > { %s736_s21 = scalar_lea.hbm %s843_s0, %s401_s17  ;;  %s142_s27 = scalar_lea.sflag [#allocation3], %s141_s29 }
  0x1c   : > { %s494_s3 = scalar_lea.hbm %s736_s21, 64  ;;  %p496_p3 = pneg %p729_p0 }
  0x1d   : > { %p495_p4 = scmp.ne.s32.totalorder %s736_s21, %s494_s3  ;;  %s499_s5 = scalar_lea.hbm %s843_s0, 256 }
  0x1e   : > { %p500_p7 = scmp.lt.u32.totalorder %s736_s21, %s843_s0  ;;  %p501_p10 = scmp.lt.u32.totalorder %s499_s5, %s494_s3 }
  0x1f   : > { %p497_p5 = pnand %p496_p3, %p495_p4  ;;  %p503_p13 = scmp.lt.u32.totalorder %s494_s3, %s736_s21 }
  0x20   : > { %p502_p11 = por %p501_p10, %p500_p7 }
  0x21   : > { %p498_p6 = pneg %p497_p5 }
  0x22   : > { %p504_p1 = por %p503_p13, %p502_p11 }
  0x24   : > { %p505_p2 = pnand %p504_p1, %p498_p6 }
  0x26   : > { %508 = shalt.err (!%p505_p2)
}
  0x27   : > { %s509_s29 = scalar_lea.vmem %s725_s7, 64  ;;  %s624_s17 = smov [#allocation2]  }
  0x28   : > { %p510_p4 = scmp.ne.s32.totalorder %s725_s7, %s509_s29  ;;  %s514_s22 = sshll.u32 %s624_s17, 4  ;;  %s515_s22 = int_to_ptr.vmem [resolvable:$false] %s514_s22 }
  0x29   : > { %s516_s26 = scalar_lea.vmem %s515_s22, 128  ;;  %p517_p9 = scmp.lt.s32.totalorder %s725_s7, %s515_s22 }
  0x2a   : > { %p512_p5 = pnand %p510_p4, %p496_p3  ;;  %p518_p7 = scmp.lt.s32.totalorder %s516_s26, %s509_s29 }
  0x2c   : > { %p513_p12 = pneg %p512_p5  ;;  %p519_p10 = por %p518_p7, %p517_p9 }
  0x2e   : > { %p520_p11 = pnand %p519_p10, %p513_p12 }
  0x30   : > { %523 = shalt.err (!%p520_p11)
}
  0x31   : > { %419 = dma.hbm_to_vmem [thread:$0]  (!%p729_p0), %s736_s21, 64, %s725_s7, %s142_s27  }
  0x32   : > { %p852_p1 = scmp.lt.s32.totalorder %s622_s16, 5  ;;  %p853_p2 = scmp.ge.s32.totalorder %s622_s16, 1 }
  0x34   : > { %p170_p3 = pnand %p853_p2, %p852_p1 }
  0x35   : > { %s770_s3 = sand.u32 (!%p170_p3), 1, %s598_s10  }
  0x36   : > { %173 = sbr.rel (%p170_p3) target bundleno = 222 (0xde), region = 28  ;;  %s403_s23 = sshll.u32 (!%p170_p3), %s770_s3, 2 }
  0x37   : > { %s176_s4 = scalar_lea.sflag (!%p170_p3), [#allocation3], %s770_s3  ;;  %s179_s5 = scalar_lea.vmem (!%p170_p3), [#allocation2], %s403_s23 }
  0x3d   : > { %585 = dma.done.wait (%p704_p8), %s176_s4, 64  }
  0x3e   : > { %587 = vsyncadd (%p704_p8), %s176_s4, 4294967232  ;;  %p205_p9 = scmp.lt.s32.totalorder %s606_s12, 1  ;;  %v625_v0 = vmov 0   ;;  %v626_v2 = vmov 1   ;;  %v218_v3 = vlaneseq  ;;  %v210_v9 = vld [vmem:[%s179_s5] sm:$0xf] }
  0x3f   : > { %492 = vset.pattern.permute.xlu0 %v625_v0  ;;  %s404_s24 = sshll.u32 %s770_s3, 3  ;;  %s407_s8 = sshll.u32 %s606_s12, 1 }
  0x40   : > { %s206_s7 = scalar_select %p205_p9, %s606_s12, 1  ;;  %v219_v4 = vshrl.u32 %v218_v3, 7 }
  0x41   : > { %s408_s29 = sshll.u32 %s610_s13, 2  ;;  %s203_s26 = scalar_lea.vmem [#allocation5], %s404_s24 }
  0x42   : > { %s405_s18 = sshll.u32 %s206_s7, 2  ;;  %v220_v5 = vsub.s32 0, %v219_v4  ;;  %v224_v6 = vsub.s32 2, %v219_v4  ;;  %v244_v7 = vsub.s32 1, %v219_v4  ;;  %v248_v8 = vsub.s32 3, %v219_v4  ;;  %s284_s17 = sadd.s32 %s408_s29, %s407_s8 }
  0x43   : > { %s208_s6 = scalar_lea.vmem %s844_s1, %s405_s18  ;;  %s409_s22 = sshll.u32 %s284_s17, 6 }
  0x44   : > { %v211_v1 = vld [vmem:[%s208_s6] sm:$0xf]  ;;  %v221_v10 = vrot.slane %v210_v9, %v220_v5  ;;  %v225_v11 = vrot.slane %v210_v9, %v224_v6  ;;  %v245_v12 = vrot.slane %v210_v9, %v244_v7  ;;  %v249_v13 = vrot.slane %v210_v9, %v248_v8  ;;  %s288_s23 = sshll.u32 %s203_s26, 4  ;;  %s789_s4 = scalar_lea.hbm %s845_s2, %s409_s22  ;;  %s791_s23 = int_to_ptr.vmem [resolvable:$true] %s288_s23 }
  0x45   : > { %214 = vperm.xlu0 %492, %v211_v1   ;;  %s270_s5 = scalar_lea.sflag [#allocation4], %s770_s3  ;;  %s524_s7 = scalar_lea.vmem %s791_s23, 128 }
  0x46   : > { %v231_v15 = vrot.slane %v221_v10, %v220_v5  ;;  %v235_v16 = vrot.slane %v225_v11, %v220_v5  ;;  %v255_v17 = vrot.slane %v245_v12, %v244_v7  ;;  %v259_v18 = vrot.slane %v249_v13, %v244_v7  ;;  %p525_p8 = scmp.ne.s32.totalorder %s791_s23, %s524_s7  ;;  %p854_p12 = scmp.ne.s32.totalorder %s849_s25, 0 }
  0x47   : > { %s627_s18 = smov [#allocation5]  }
  0x48   : > { %p526_p0 = pnand %p525_p8, %p854_p12  ;;  %s528_s21 = sshll.u32 %s627_s18, 4  ;;  %s529_s21 = int_to_ptr.vmem [resolvable:$false] %s528_s21 }
  0x49   : > { %493 = vset.pattern.permute.xlu0 %v626_v2  ;;  %s530_s27 = scalar_lea.vmem %s529_s21, 256  ;;  %p531_p13 = scmp.lt.s32.totalorder %s791_s23, %s529_s21 }
  0x4a   : > { %239 = vperm.xlu0 %493, %v211_v1   ;;  %p527_p6 = pneg %p526_p0  ;;  %p532_p4 = scmp.lt.s32.totalorder %s530_s27, %s524_s7 }
  0x4c   : > { %p533_p5 = por %p532_p4, %p531_p13 }
  0x4e   : > { %p534_p7 = pnand %p533_p5, %p527_p6 }
  0xc4   : > { %v215_v14 = vpop.permute.xlu0 %214 }
  0xc5   : > { %v236_v20 = vmul.f32 %v231_v15, %v215_v14  ;;  %v237_v21 = vmul.f32 %v235_v16, %v215_v14 }
  0xc9   : > { %v240_v19 = vpop.permute.xlu0 %239 }
  0xca   : > { %v260_v22 = vmul.f32 %v255_v17, %v240_v19  ;;  %v261_v23 = vmul.f32 %v259_v18, %v240_v19 }
  0xcc   : > { %v262_v24 = vadd.f32 %v260_v22, %v236_v20  ;;  %v263_v25 = vadd.f32 %v261_v23, %v237_v21 }
  0xce   : > { %v266_v26 = vcombine.low %v262_v24, %v263_v25 }
  0xd0   : > { %268 = vst [vmem:[%s203_s26] sm:$0xff] %v266_v26 }
  0xd1   : > { %537 = shalt.err (!%p534_p7)
}
  0xd2   : > { %s538_s3 = scalar_lea.hbm %s789_s4, 128  ;;  %s542_s8 = scalar_lea.hbm %s845_s2, 512 }
  0xd3   : > { %p539_p10 = scmp.ne.s32.totalorder %s789_s4, %s538_s3  ;;  %p543_p2 = scmp.lt.u32.totalorder %s789_s4, %s845_s2 }
  0xd4   : > { %p544_p3 = scmp.lt.u32.totalorder %s542_s8, %s538_s3  ;;  %p546_p8 = scmp.lt.u32.totalorder %s538_s3, %s789_s4 }
  0xd5   : > { %p540_p11 = pnand %p539_p10, %p854_p12 }
  0xd6   : > { %p545_p9 = por %p544_p3, %p543_p2 }
  0xd7   : > { %p541_p1 = pneg %p540_p11 }
  0xd8   : > { %p547_p0 = por %p546_p8, %p545_p9 }
  0xda   : > { %p548_p6 = pnand %p547_p0, %p541_p1 }
  0xdc   : > { %551 = shalt.err (!%p548_p6)
}
  0xdd   : > { %414 = dma.vmem_to_hbm [thread:$0]  (%p854_p12), %s791_s23, 128, %s789_s4, %s270_s5  }
  0xde PF: > { %p425_p13 = scmp.ge.s32.totalorder %s622_s16, 2  ;;  %s300_s22 = sand.u32 1, %s594_s9  }
  0xdf   : > { %p855_p4 = scmp.ne.s32.totalorder %s850_s28, 0  ;;  %s301_s26 = scalar_lea.sflag [#allocation4], %s300_s22 }
  0xe1   : > { %p421_p5 = pnand %p425_p13, %p855_p4 }
  0xe3   : > { %589 = dma.done.wait (!%p421_p5), %s301_s26, 128  }
  0xe4   : > { %591 = vsyncadd (!%p421_p5), %s301_s26, 4294967168  ;;  %s18_s16 = sadd.s32 1, %s622_s16   ;;  %s856_s9 = smov %s598_s10 }
  0xe5   : > { %p15_p7 = scmp.ge.s32.totalorder %s18_s16, 6   ;;  %s857_s10 = smov %s602_s11 }
  0xe6   : > { %s858_s11 = smov %s721_s30  ;;  %s859_s12 = smov %s614_s14 }
  0xe7   : > { %s860_s13 = smov %s618_s15  ;;  %s861_s14 = smov %s864_s19 }
  0xe8   : > { %s862_s15 = smov %s868_s20  ;;  %17 = sbr.rel (!%p15_p7) target bundleno = 7 (0x7), region = 76 }
  0xef   :  { %306 = vsyncpa [#allocation3], 1 }
  0xf0   :  { %308 = vsyncpa [#allocation3 + $0x1], 1 }
  0xf1   :  { %309 = vsyncpa [#allocation4], 1 }
  0xf2   :  { %311 = vsyncpa [#allocation4 + $0x1], 1 }

</bundles_post_ra>
